<compile_context>
chip_gen: v6e
topology: v6e:2x2x1
jax: 0.10.0
libtpu: 0.0.40
codegen_flags: <defaults>
</compile_context>

<pallas_src>
import functools

import jax
import jax.numpy as jnp
import numpy as np
from jax.experimental import pallas as pl
from jax.experimental.pallas import tpu as pltpu


def _rvnn_kernel(xe_ref,          # VMEM (num_nodes, H)  bf16  (level-ordered)
                 w_fused_ref,     # VMEM (H, GP) bf16 = [Wz.T |0| Wr.T |0| Wh.T |0]
                 b_fused_ref,     # VMEM (1, GP) f32  = [bz   |0| br   |0| bh   |0]
                 u_zr_ref,        # VMEM (H, GP) bf16 = [Uz.T |0| Ur.T |0| 0]
                 uh_pad_ref,      # VMEM (H, GB) bf16 = [Uh.T | 0]
                 s_ref,           # VMEM (num_parents, num_nodes) f32 selection
                 wout_sum_ref,    # VMEM (1, Nclass) = Wout.sum(axis=1)
                 bout_ref,        # VMEM (1, Nclass)
                 out_ref,         # VMEM (1, Nclass)
                 node_h_ref,      # scratch VMEM (num_nodes, H) f32
                 xg_ref,          # scratch VMEM (num_nodes, GP) f32
                 *, num_leaves, num_parents, level_sizes, hidden, gate_block):
    f32 = jnp.float32
    bf16 = jnp.bfloat16
    H = hidden
    GB = gate_block          # 128: each gate gets its own vreg-aligned block

    # Zero node_h so the level gather matmul never reads uninitialized VMEM
    # (0-coefficient * garbage-NaN would still poison the accumulation).
    node_h_ref[...] = jnp.zeros_like(node_h_ref)

    # Hoisted, fused W-side gate pre-activations for ALL nodes:
    #   xg = xe @ [Wz.T | Wr.T | Wh.T] + [bz | br | bh]   (one bf16 MXU matmul)
    xg_ref[...] = (jnp.dot(xe_ref[...], w_fused_ref[...],
                           preferred_element_type=f32)
                   + b_fused_ref[...])

    # ---- leaves: child_h == 0  =>  h = (1 - z) * tanh(c_pre), fully batched.
    xg_l = xg_ref[pl.ds(0, num_leaves), :]
    z_l = jax.nn.sigmoid(xg_l[:, 0:H])
    c_l = jnp.tanh(xg_l[:, 2 * GB:2 * GB + H])
    leaf_h = (1.0 - z_l) * c_l
    node_h_ref[pl.ds(0, num_leaves), :] = leaf_h

    # Running sum of node_h column 0 (readout = mean over nodes of column 0).
    h0_sum = jnp.sum(leaf_h[:, 0:1])

    u_zr = u_zr_ref[...]         # (H, GP) bf16
    uh_pad = uh_pad_ref[...]     # (H, GB) bf16

    # ---- level-scheduled bottom-up GRU recurrence.  Static Python loop over
    #      depth levels (fully unrolled); each level = 3 small batched matmuls.
    p_off = 0
    for P_L in level_sizes:
        row0 = num_leaves + p_off                               # static int
        # Child gather + per-parent sum as a 0/1 selection matmul.
        s_blk = s_ref[pl.ds(p_off, P_L), :].astype(bf16)        # (P_L, N)
        h_tilde = jnp.dot(s_blk, node_h_ref[...].astype(bf16),
                          preferred_element_type=f32)           # (P_L, H)

        g = (xg_ref[pl.ds(row0, P_L), :]
             + jnp.dot(h_tilde.astype(bf16), u_zr,
                       preferred_element_type=f32))             # (P_L, GP)
        z = jax.nn.sigmoid(g[:, 0:H])
        r = jax.nn.sigmoid(g[:, GB:GB + H])
        uc = jnp.dot((h_tilde * r).astype(bf16), uh_pad,
                     preferred_element_type=f32)                # (P_L, GB)
        c = jnp.tanh(g[:, 2 * GB:2 * GB + H] + uc[:, 0:H])
        # TODO(synk): nn.Dropout(0.1) on `c` treated as identity (eval mode).
        h = z * h_tilde + (1.0 - z) * c                         # (P_L, H)

        node_h_ref[pl.ds(row0, P_L), :] = h
        h0_sum = h0_sum + jnp.sum(h[:, 0:1])
        p_off += P_L

    # ---- readout: final_state = node_h.mean(dim=0)[0]   (a scalar)
    final_state = h0_sum / float(num_leaves + num_parents)
    logits = final_state * wout_sum_ref[...] + bout_ref[...]    # (1, Nclass)
    m = jnp.max(logits, axis=-1, keepdims=True)
    e = jnp.exp(logits - m)
    out_ref[...] = e / jnp.sum(e, axis=-1, keepdims=True)


def rvnn_forward(params, x_word, x_index, tree):
    E, Wz, Uz, bz, Wr, Ur, br, Wh, Uh, bh, Wout, bout = params
    H = E.shape[0]
    Nclass = Wout.shape[0]
    num_nodes = x_word.shape[0]

    tree_np = np.asarray(tree)
    num_parents = tree_np.shape[0]
    num_leaves = num_nodes - num_parents
    num_children = tree_np.shape[1] - 1          # last column ignored (parent id)

    GB = 128                                     # per-gate lane block (vreg aligned)
    GP = 3 * GB

    # ---------- host-side level schedule (tree is concrete data) ----------
    children = tree_np[:, :num_children].astype(np.int64)
    node_depth = np.zeros(num_nodes, dtype=np.int64)            # leaves: depth 0
    for p in range(num_parents):
        ch = children[p]
        valid = ch[ch > -1]
        node_depth[num_leaves + p] = 1 + (int(node_depth[valid].max())
                                          if valid.size else 0)
    parent_depth = node_depth[num_leaves:]
    order = np.argsort(parent_depth, kind="stable")             # parents by level
    new_pos = np.empty(max(num_parents, 1), dtype=np.int64)
    new_pos[order] = np.arange(num_parents)
    if num_parents > 0:
        _, counts = np.unique(parent_depth[order], return_counts=True)
        level_sizes = tuple(int(c) for c in counts)
    else:
        level_sizes = ()

    # 0/1 selection matrix (rows: level-ordered parents, cols: remapped nodes).
    S_np = np.zeros((max(num_parents, 1), num_nodes), np.float32)
    for newp in range(num_parents):
        op = int(order[newp])
        for c in children[op]:
            c = int(c)
            if c > -1:
                nc = c if c < num_leaves else num_leaves + int(new_pos[c - num_leaves])
                S_np[newp, nc] += 1.0

    # ---------- glue: sparse embedding gather (no vocab-sized matmul) ------
    # xe[n] = sum_j E[:, x_index[n, j]] * x_word[n, j]
    xe = jnp.einsum("nkh,nk->nh",
                    jnp.take(E.T, x_index, axis=0),
                    x_word.astype(jnp.float32))
    # Reorder parent rows to level order (readout is permutation-invariant).
    perm = np.concatenate([np.arange(num_leaves),
                           num_leaves + order]).astype(np.int32)
    xe = jnp.take(xe, perm, axis=0).astype(jnp.bfloat16)

    # Fused, lane-block-padded gate weights (pre-transposed for row-vec @ mat).
    w_fused = jnp.zeros((H, GP), jnp.float32)
    w_fused = (w_fused.at[:, 0:H].set(Wz.T)
                       .at[:, GB:GB + H].set(Wr.T)
                       .at[:, 2 * GB:2 * GB + H].set(Wh.T)).astype(jnp.bfloat16)
    b_fused = jnp.zeros((1, GP), jnp.float32)
    b_fused = (b_fused.at[0, 0:H].set(bz)
                       .at[0, GB:GB + H].set(br)
                       .at[0, 2 * GB:2 * GB + H].set(bh))
    u_zr = jnp.zeros((H, GP), jnp.float32)
    u_zr = (u_zr.at[:, 0:H].set(Uz.T)
                 .at[:, GB:GB + H].set(Ur.T)).astype(jnp.bfloat16)
    uh_pad = jnp.zeros((H, GB), jnp.float32).at[:, 0:H].set(Uh.T).astype(jnp.bfloat16)

    wout_sum = jnp.sum(Wout, axis=1)[None, :]                   # (1, Nclass)
    S = jnp.asarray(S_np, dtype=jnp.float32)

    kernel = functools.partial(_rvnn_kernel,
                               num_leaves=num_leaves,
                               num_parents=num_parents,
                               level_sizes=level_sizes,
                               hidden=H,
                               gate_block=GB)

    vmem = pl.BlockSpec(memory_space=pltpu.MemorySpace.VMEM)

    out = pl.pallas_call(
        kernel,
        out_shape=jax.ShapeDtypeStruct((1, Nclass), jnp.float32),
        in_specs=[vmem] * 8,
        out_specs=vmem,
        scratch_shapes=[pltpu.VMEM((num_nodes, H), jnp.float32),
                        pltpu.VMEM((num_nodes, GP), jnp.float32)],
    )(xe, w_fused, b_fused, u_zr, uh_pad, S, wout_sum, bout[None, :])
    return out[0]


def rvnn_reference(params, x_word, x_index, tree):
    """Pure-JAX mirror of the PyTorch forward (eval mode)."""
    E, Wz, Uz, bz, Wr, Ur, br, Wh, Uh, bh, Wout, bout = params
    hidden = E.shape[0]
    num_nodes = x_word.shape[0]
    num_parents = tree.shape[0]
    num_leaves = num_nodes - num_parents

    def unit(xe, h_tilde):
        z = jax.nn.sigmoid((Wz * xe).sum(1) + (Uz * h_tilde).sum(1) + bz)
        r = jax.nn.sigmoid((Wr * xe).sum(1) + (Ur * h_tilde).sum(1) + br)
        c = jnp.tanh((Wh * xe).sum(1) + (Uh * (h_tilde * r)).sum(1) + bh)
        return z * h_tilde + (1.0 - z) * c

    xe_all = [(E[:, x_index[n]] * x_word[n]).sum(axis=1) for n in range(num_nodes)]
    node_h = [unit(xe_all[n], jnp.zeros((hidden,), jnp.float32))
              for n in range(num_leaves)]
    for p in range(num_parents):
        h_tilde = jnp.zeros((hidden,), jnp.float32)
        for j in range(tree.shape[1] - 1):
            cidx = int(tree[p, j])
            if cidx > -1:
                h_tilde = h_tilde + node_h[cidx]
        node_h.append(unit(xe_all[num_leaves + p], h_tilde))
    nh = jnp.stack(node_h)
    final_state = jnp.mean(nh[:, 0])
    logits = (Wout * final_state).sum(axis=1) + bout
    return jax.nn.softmax(logits)


def init_params(key, word_dim, hidden_dim, Nclass):
    ks = jax.random.split(key, 8)
    def mat(k, shape):
        return 0.1 * jax.random.normal(k, shape, dtype=jnp.float32)
    E    = mat(ks[0], (hidden_dim, word_dim))
    Wz   = mat(ks[1], (hidden_dim, hidden_dim))
    Uz   = mat(ks[2], (hidden_dim, hidden_dim))
    bz   = jnp.zeros((hidden_dim,), jnp.float32)
    Wr   = mat(ks[3], (hidden_dim, hidden_dim))
    Ur   = mat(ks[4], (hidden_dim, hidden_dim))
    br   = jnp.zeros((hidden_dim,), jnp.float32)
    Wh   = mat(ks[5], (hidden_dim, hidden_dim))
    Uh   = mat(ks[6], (hidden_dim, hidden_dim))
    bh   = jnp.zeros((hidden_dim,), jnp.float32)
    Wout = mat(ks[7], (Nclass, hidden_dim))
    bout = jnp.zeros((Nclass,), jnp.float32)
    return (E, Wz, Uz, bz, Wr, Ur, br, Wh, Uh, bh, Wout, bout)


if __name__ == "__main__":
    word_dim, hidden_dim, Nclass = 64, 32, 4
    num_nodes, num_parents, words_per_node = 8, 3, 6
    num_leaves = num_nodes - num_parents

    key = jax.random.PRNGKey(0)
    kp, kw, ki = jax.random.split(key, 3)

    params = init_params(kp, word_dim, hidden_dim, Nclass)

    x_word = jax.random.uniform(kw, (num_nodes, words_per_node),
                                dtype=jnp.float32, minval=0.0, maxval=2.0)
    x_index = jax.random.randint(ki, (num_nodes, words_per_node), 0, word_dim,
                                 dtype=jnp.int32)
    # Tree rows: [child indices..., last col ignored]; -1 = no child.
    # Leaves are nodes 0..4, parents become nodes 5, 6, 7 (bottom-up order).
    tree = jnp.array([[0, 1, -1, 5],
                      [2, 3, -1, 6],
                      [4, 5,  6, 7]], dtype=jnp.int32)

    pred = jax.block_until_ready(rvnn_forward(params, x_word, x_index, tree))
    ref = jax.block_until_ready(rvnn_reference(params, x_word, x_index, tree))

    np.testing.assert_allclose(np.asarray(pred), np.asarray(ref),
                               rtol=5e-3, atol=5e-3)
    assert pred.shape == (Nclass,)
    assert np.isfinite(np.asarray(pred)).all()
    print("KERNEL_OK")
</pallas_src>

<mosaic_0001>
module attributes {stable_mosaic.version = 11 : i64} {
  func.func @_rvnn_kernel(%arg0: memref<8x32xbf16, #tpu.memory_space<vmem>>, %arg1: memref<32x384xbf16, #tpu.memory_space<vmem>>, %arg2: memref<1x384xf32, #tpu.memory_space<vmem>>, %arg3: memref<32x384xbf16, #tpu.memory_space<vmem>>, %arg4: memref<32x128xbf16, #tpu.memory_space<vmem>>, %arg5: memref<3x8xf32, #tpu.memory_space<vmem>>, %arg6: memref<1x4xf32, #tpu.memory_space<vmem>>, %arg7: memref<1x4xf32, #tpu.memory_space<vmem>>, %arg8: memref<1x4xf32, #tpu.memory_space<vmem>>, %arg9: memref<8x32xf32, #tpu.memory_space<vmem>>, %arg10: memref<8x384xf32, #tpu.memory_space<vmem>>) attributes {dimension_semantics = [], scalar_prefetch = 0 : i64, scratch_operands = 2 : i64, tpu.core_type = #tpu.core_type<tc>} {
    %cst = arith.constant 0.000000e+00 : f32
    %0 = vector.broadcast %cst : f32 to vector<8x32xf32>
    %c0 = arith.constant 0 : index
    %c0_0 = arith.constant 0 : index
    %1 = vector.load %arg9[%c0, %c0_0] : memref<8x32xf32, #tpu.memory_space<vmem>>, vector<8x32xf32>
    tpu.vector_store %arg9[%c0, %c0_0], %0 {strides = array<i32>} : memref<8x32xf32, #tpu.memory_space<vmem>>, vector<8x32xf32>,
    %c0_1 = arith.constant 0 : index
    %c0_2 = arith.constant 0 : index
    %2 = vector.load %arg0[%c0_1, %c0_2] : memref<8x32xbf16, #tpu.memory_space<vmem>>, vector<8x32xbf16>
    %c0_3 = arith.constant 0 : index
    %c0_4 = arith.constant 0 : index
    %3 = vector.load %arg1[%c0_3, %c0_4] : memref<32x384xbf16, #tpu.memory_space<vmem>>, vector<32x384xbf16>
    %cst_5 = arith.constant dense<0.000000e+00> : vector<8x384xf32>
    %4 = tpu.matmul %2, %3, %cst_5 {dimension_numbers = #tpu.dot_dimension_numbers<[1], [0], [0], [1], [0, 0, 1, 1], [], []>} : vector<8x32xbf16>, vector<32x384xbf16>, vector<8x384xf32> -> vector<8x384xf32>
    %c0_6 = arith.constant 0 : index
    %c0_7 = arith.constant 0 : index
    %5 = vector.load %arg2[%c0_6, %c0_7] : memref<1x384xf32, #tpu.memory_space<vmem>>, vector<1x384xf32>
    %6 = vector.broadcast %5 : vector<1x384xf32> to vector<8x384xf32>
    %7 = arith.addf %4, %6 : vector<8x384xf32>
    %c0_8 = arith.constant 0 : index
    %c0_9 = arith.constant 0 : index
    %8 = vector.load %arg10[%c0_8, %c0_9] : memref<8x384xf32, #tpu.memory_space<vmem>>, vector<8x384xf32>
    tpu.vector_store %arg10[%c0_8, %c0_9], %7 {strides = array<i32>} : memref<8x384xf32, #tpu.memory_space<vmem>>, vector<8x384xf32>,
    %c0_10 = arith.constant 0 : index
    %c0_11 = arith.constant 0 : index
    %9 = vector.load %arg10[%c0_10, %c0_11] : memref<8x384xf32, #tpu.memory_space<vmem>>, vector<5x384xf32>
    %10 = vector.extract_strided_slice %9 {offsets = [0, 0], sizes = [5, 32], strides = [1, 1]} : vector<5x384xf32> to vector<5x32xf32>
    %11 = arith.negf %10 : vector<5x32xf32>
    %12 = math.exp %11 : vector<5x32xf32>
    %cst_12 = arith.constant 1.000000e+00 : f32
    %13 = vector.broadcast %cst_12 : f32 to vector<5x32xf32>
    %14 = arith.addf %13, %12 : vector<5x32xf32>
    %15 = arith.divf %13, %14 : vector<5x32xf32>
    %16 = vector.extract_strided_slice %9 {offsets = [0, 256], sizes = [5, 32], strides = [1, 1]} : vector<5x384xf32> to vector<5x32xf32>
    %17 = math.tanh %16 : vector<5x32xf32>
    %cst_13 = arith.constant 1.000000e+00 : f32
    %18 = vector.broadcast %cst_13 : f32 to vector<5x32xf32>
    %19 = arith.subf %18, %15 : vector<5x32xf32>
    %20 = arith.mulf %19, %17 : vector<5x32xf32>
    %c0_14 = arith.constant 0 : index
    %c0_15 = arith.constant 0 : index
    %21 = vector.load %arg9[%c0_14, %c0_15] : memref<8x32xf32, #tpu.memory_space<vmem>>, vector<5x32xf32>
    tpu.vector_store %arg9[%c0_14, %c0_15], %20 {strides = array<i32>} : memref<8x32xf32, #tpu.memory_space<vmem>>, vector<5x32xf32>,
    %22 = vector.extract_strided_slice %20 {offsets = [0, 0], sizes = [5, 1], strides = [1, 1]} : vector<5x32xf32> to vector<5x1xf32>
    %23 = vector.shape_cast %22 : vector<5x1xf32> to vector<1x5x1xf32>
    %cst_16 = arith.constant dense<0.000000e+00> : vector<1xf32>
    %24 = vector.multi_reduction <add>, %23, %cst_16 [1, 2] : vector<1x5x1xf32> to vector<1xf32>
    %25 = vector.shape_cast %24 : vector<1xf32> to vector<1x1x1xf32>
    %26 = vector.extract %25[0, 0, 0] : f32 from vector<1x1x1xf32>
    %c0_17 = arith.constant 0 : index
    %c0_18 = arith.constant 0 : index
    %27 = vector.load %arg3[%c0_17, %c0_18] : memref<32x384xbf16, #tpu.memory_space<vmem>>, vector<32x384xbf16>
    %c0_19 = arith.constant 0 : index
    %c0_20 = arith.constant 0 : index
    %28 = vector.load %arg4[%c0_19, %c0_20] : memref<32x128xbf16, #tpu.memory_space<vmem>>, vector<32x128xbf16>
    %c0_21 = arith.constant 0 : index
    %c0_22 = arith.constant 0 : index
    %29 = vector.load %arg5[%c0_21, %c0_22] : memref<3x8xf32, #tpu.memory_space<vmem>>, vector<2x8xf32>
    %30 = arith.truncf %29 : vector<2x8xf32> to vector<2x8xbf16>
    %c0_23 = arith.constant 0 : index
    %c0_24 = arith.constant 0 : index
    %31 = vector.load %arg9[%c0_23, %c0_24] : memref<8x32xf32, #tpu.memory_space<vmem>>, vector<8x32xf32>
    %32 = arith.truncf %31 : vector<8x32xf32> to vector<8x32xbf16>
    %cst_25 = arith.constant dense<0.000000e+00> : vector<2x32xf32>
    %33 = tpu.matmul %30, %32, %cst_25 {dimension_numbers = #tpu.dot_dimension_numbers<[1], [0], [0], [1], [0, 0, 1, 1], [], []>} : vector<2x8xbf16>, vector<8x32xbf16>, vector<2x32xf32> -> vector<2x32xf32>
    %c5 = arith.constant 5 : index
    %c0_26 = arith.constant 0 : index
    %34 = vector.load %arg10[%c5, %c0_26] : memref<8x384xf32, #tpu.memory_space<vmem>>, vector<2x384xf32>
    %35 = arith.truncf %33 : vector<2x32xf32> to vector<2x32xbf16>
    %cst_27 = arith.constant dense<0.000000e+00> : vector<2x384xf32>
    %36 = tpu.matmul %35, %27, %cst_27 {dimension_numbers = #tpu.dot_dimension_numbers<[1], [0], [0], [1], [0, 0, 1, 1], [], []>} : vector<2x32xbf16>, vector<32x384xbf16>, vector<2x384xf32> -> vector<2x384xf32>
    %37 = arith.addf %34, %36 : vector<2x384xf32>
    %38 = vector.extract_strided_slice %37 {offsets = [0, 0], sizes = [2, 32], strides = [1, 1]} : vector<2x384xf32> to vector<2x32xf32>
    %39 = arith.negf %38 : vector<2x32xf32>
    %40 = math.exp %39 : vector<2x32xf32>
    %cst_28 = arith.constant 1.000000e+00 : f32
    %41 = vector.broadcast %cst_28 : f32 to vector<2x32xf32>
    %42 = arith.addf %41, %40 : vector<2x32xf32>
    %43 = arith.divf %41, %42 : vector<2x32xf32>
    %44 = vector.extract_strided_slice %37 {offsets = [0, 128], sizes = [2, 32], strides = [1, 1]} : vector<2x384xf32> to vector<2x32xf32>
    %45 = arith.negf %44 : vector<2x32xf32>
    %46 = math.exp %45 : vector<2x32xf32>
    %cst_29 = arith.constant 1.000000e+00 : f32
    %47 = vector.broadcast %cst_29 : f32 to vector<2x32xf32>
    %48 = arith.addf %47, %46 : vector<2x32xf32>
    %49 = arith.divf %47, %48 : vector<2x32xf32>
    %50 = arith.mulf %33, %49 : vector<2x32xf32>
    %51 = arith.truncf %50 : vector<2x32xf32> to vector<2x32xbf16>
    %cst_30 = arith.constant dense<0.000000e+00> : vector<2x128xf32>
    %52 = tpu.matmul %51, %28, %cst_30 {dimension_numbers = #tpu.dot_dimension_numbers<[1], [0], [0], [1], [0, 0, 1, 1], [], []>} : vector<2x32xbf16>, vector<32x128xbf16>, vector<2x128xf32> -> vector<2x128xf32>
    %53 = vector.extract_strided_slice %37 {offsets = [0, 256], sizes = [2, 32], strides = [1, 1]} : vector<2x384xf32> to vector<2x32xf32>
    %54 = vector.extract_strided_slice %52 {offsets = [0, 0], sizes = [2, 32], strides = [1, 1]} : vector<2x128xf32> to vector<2x32xf32>
    %55 = arith.addf %53, %54 : vector<2x32xf32>
    %56 = math.tanh %55 : vector<2x32xf32>
    %57 = arith.mulf %43, %33 : vector<2x32xf32>
    %cst_31 = arith.constant 1.000000e+00 : f32
    %58 = vector.broadcast %cst_31 : f32 to vector<2x32xf32>
    %59 = arith.subf %58, %43 : vector<2x32xf32>
    %60 = arith.mulf %59, %56 : vector<2x32xf32>
    %61 = arith.addf %57, %60 : vector<2x32xf32>
    %c5_32 = arith.constant 5 : index
    %c0_33 = arith.constant 0 : index
    %62 = vector.load %arg9[%c5_32, %c0_33] : memref<8x32xf32, #tpu.memory_space<vmem>>, vector<2x32xf32>
    tpu.vector_store %arg9[%c5_32, %c0_33], %61 {strides = array<i32>} : memref<8x32xf32, #tpu.memory_space<vmem>>, vector<2x32xf32>,
    %63 = vector.extract_strided_slice %61 {offsets = [0, 0], sizes = [2, 1], strides = [1, 1]} : vector<2x32xf32> to vector<2x1xf32>
    %64 = vector.shape_cast %63 : vector<2x1xf32> to vector<1x2x1xf32>
    %cst_34 = arith.constant dense<0.000000e+00> : vector<1xf32>
    %65 = vector.multi_reduction <add>, %64, %cst_34 [1, 2] : vector<1x2x1xf32> to vector<1xf32>
    %66 = vector.shape_cast %65 : vector<1xf32> to vector<1x1x1xf32>
    %67 = vector.extract %66[0, 0, 0] : f32 from vector<1x1x1xf32>
    %68 = arith.addf %26, %67 : f32
    %c2 = arith.constant 2 : index
    %c0_35 = arith.constant 0 : index
    %69 = vector.load %arg5[%c2, %c0_35] : memref<3x8xf32, #tpu.memory_space<vmem>>, vector<1x8xf32>
    %70 = arith.truncf %69 : vector<1x8xf32> to vector<1x8xbf16>
    %c0_36 = arith.constant 0 : index
    %c0_37 = arith.constant 0 : index
    %71 = vector.load %arg9[%c0_36, %c0_37] : memref<8x32xf32, #tpu.memory_space<vmem>>, vector<8x32xf32>
    %72 = arith.truncf %71 : vector<8x32xf32> to vector<8x32xbf16>
    %cst_38 = arith.constant dense<0.000000e+00> : vector<1x32xf32>
    %73 = tpu.matmul %70, %72, %cst_38 {dimension_numbers = #tpu.dot_dimension_numbers<[1], [0], [0], [1], [0, 0, 1, 1], [], []>} : vector<1x8xbf16>, vector<8x32xbf16>, vector<1x32xf32> -> vector<1x32xf32>
    %c7 = arith.constant 7 : index
    %c0_39 = arith.constant 0 : index
    %74 = vector.load %arg10[%c7, %c0_39] : memref<8x384xf32, #tpu.memory_space<vmem>>, vector<1x384xf32>
    %75 = arith.truncf %73 : vector<1x32xf32> to vector<1x32xbf16>
    %cst_40 = arith.constant dense<0.000000e+00> : vector<1x384xf32>
    %76 = tpu.matmul %75, %27, %cst_40 {dimension_numbers = #tpu.dot_dimension_numbers<[1], [0], [0], [1], [0, 0, 1, 1], [], []>} : vector<1x32xbf16>, vector<32x384xbf16>, vector<1x384xf32> -> vector<1x384xf32>
    %77 = arith.addf %74, %76 : vector<1x384xf32>
    %78 = vector.extract_strided_slice %77 {offsets = [0, 0], sizes = [1, 32], strides = [1, 1]} : vector<1x384xf32> to vector<1x32xf32>
    %79 = arith.negf %78 : vector<1x32xf32>
    %80 = math.exp %79 : vector<1x32xf32>
    %cst_41 = arith.constant 1.000000e+00 : f32
    %81 = vector.broadcast %cst_41 : f32 to vector<1x32xf32>
    %82 = arith.addf %81, %80 : vector<1x32xf32>
    %83 = arith.divf %81, %82 : vector<1x32xf32>
    %84 = vector.extract_strided_slice %77 {offsets = [0, 128], sizes = [1, 32], strides = [1, 1]} : vector<1x384xf32> to vector<1x32xf32>
    %85 = arith.negf %84 : vector<1x32xf32>
    %86 = math.exp %85 : vector<1x32xf32>
    %cst_42 = arith.constant 1.000000e+00 : f32
    %87 = vector.broadcast %cst_42 : f32 to vector<1x32xf32>
    %88 = arith.addf %87, %86 : vector<1x32xf32>
    %89 = arith.divf %87, %88 : vector<1x32xf32>
    %90 = arith.mulf %73, %89 : vector<1x32xf32>
    %91 = arith.truncf %90 : vector<1x32xf32> to vector<1x32xbf16>
    %cst_43 = arith.constant dense<0.000000e+00> : vector<1x128xf32>
    %92 = tpu.matmul %91, %28, %cst_43 {dimension_numbers = #tpu.dot_dimension_numbers<[1], [0], [0], [1], [0, 0, 1, 1], [], []>} : vector<1x32xbf16>, vector<32x128xbf16>, vector<1x128xf32> -> vector<1x128xf32>
    %93 = vector.extract_strided_slice %77 {offsets = [0, 256], sizes = [1, 32], strides = [1, 1]} : vector<1x384xf32> to vector<1x32xf32>
    %94 = vector.extract_strided_slice %92 {offsets = [0, 0], sizes = [1, 32], strides = [1, 1]} : vector<1x128xf32> to vector<1x32xf32>
    %95 = arith.addf %93, %94 : vector<1x32xf32>
    %96 = math.tanh %95 : vector<1x32xf32>
    %97 = arith.mulf %83, %73 : vector<1x32xf32>
    %cst_44 = arith.constant 1.000000e+00 : f32
    %98 = vector.broadcast %cst_44 : f32 to vector<1x32xf32>
    %99 = arith.subf %98, %83 : vector<1x32xf32>
    %100 = arith.mulf %99, %96 : vector<1x32xf32>
    %101 = arith.addf %97, %100 : vector<1x32xf32>
    %c7_45 = arith.constant 7 : index
    %c0_46 = arith.constant 0 : index
    %102 = vector.load %arg9[%c7_45, %c0_46] : memref<8x32xf32, #tpu.memory_space<vmem>>, vector<1x32xf32>
    tpu.vector_store %arg9[%c7_45, %c0_46], %101 {strides = array<i32>} : memref<8x32xf32, #tpu.memory_space<vmem>>, vector<1x32xf32>,
    %103 = vector.extract_strided_slice %101 {offsets = [0, 0], sizes = [1, 1], strides = [1, 1]} : vector<1x32xf32> to vector<1x1xf32>
    %104 = vector.shape_cast %103 : vector<1x1xf32> to vector<1x1x1xf32>
    %cst_47 = arith.constant dense<0.000000e+00> : vector<1xf32>
    %105 = vector.multi_reduction <add>, %104, %cst_47 [1, 2] : vector<1x1x1xf32> to vector<1xf32>
    %106 = vector.shape_cast %105 : vector<1xf32> to vector<1x1x1xf32>
    %107 = vector.extract %106[0, 0, 0] : f32 from vector<1x1x1xf32>
    %108 = arith.addf %68, %107 : f32
    %cst_48 = arith.constant 8.000000e+00 : f32
    %109 = arith.divf %108, %cst_48 : f32
    %c0_49 = arith.constant 0 : index
    %c0_50 = arith.constant 0 : index
    %110 = vector.load %arg6[%c0_49, %c0_50] : memref<1x4xf32, #tpu.memory_space<vmem>>, vector<1x4xf32>
    %111 = vector.broadcast %109 : f32 to vector<1x4xf32>
    %112 = arith.mulf %111, %110 : vector<1x4xf32>
    %c0_51 = arith.constant 0 : index
    %c0_52 = arith.constant 0 : index
    %113 = vector.load %arg7[%c0_51, %c0_52] : memref<1x4xf32, #tpu.memory_space<vmem>>, vector<1x4xf32>
    %114 = arith.addf %112, %113 : vector<1x4xf32>
    %cst_53 = arith.constant dense<0xFF800000> : vector<1xf32>
    %115 = vector.multi_reduction <maximumf>, %114, %cst_53 [1] : vector<1x4xf32> to vector<1xf32>
    %116 = vector.shape_cast %115 : vector<1xf32> to vector<1x1xf32>
    %117 = vector.broadcast %116 : vector<1x1xf32> to vector<1x4xf32>
    %118 = arith.subf %114, %117 : vector<1x4xf32>
    %119 = math.exp %118 : vector<1x4xf32>
    %cst_54 = arith.constant dense<0.000000e+00> : vector<1xf32>
    %120 = vector.multi_reduction <add>, %119, %cst_54 [1] : vector<1x4xf32> to vector<1xf32>
    %121 = vector.shape_cast %120 : vector<1xf32> to vector<1x1xf32>
    %122 = vector.broadcast %121 : vector<1x1xf32> to vector<1x4xf32>
    %123 = arith.divf %119, %122 : vector<1x4xf32>
    %c0_55 = arith.constant 0 : index
    %c0_56 = arith.constant 0 : index
    %124 = vector.load %arg8[%c0_55, %c0_56] : memref<1x4xf32, #tpu.memory_space<vmem>>, vector<1x4xf32>
    tpu.vector_store %arg8[%c0_55, %c0_56], %123 {strides = array<i32>} : memref<1x4xf32, #tpu.memory_space<vmem>>, vector<1x4xf32>,
    return
  }
}

</mosaic_0001>

<bundles_post_ra>
// kernel: tpu_custom_call.1
= control target key start
LH: loop header
LB: loop body
LE: loop exit
PB: predicated region body
PF: predicated region fallthrough
CT: control target
= control target key end

     0   :  { %13 = vsyncpa [#allocation5], 0  ;;  %s1265_s0 = inlined_call_operand.hbm [shape: bf16[8,32], index: 0, kind: input, shape index: {}]   ;;  %s1266_s1 = inlined_call_operand.hbm [shape: bf16[32,384], index: 1, kind: input, shape index: {}]   ;;  %s1267_s2 = inlined_call_operand.vmem [shape: f32[1,384], index: 2, kind: input, shape index: {}]   ;;  %s1268_s3 = inlined_call_operand.hbm [shape: bf16[32,384], index: 3, kind: input, shape index: {}]   ;;  %s1269_s4 = inlined_call_operand.hbm [shape: bf16[32,128], index: 4, kind: input, shape index: {}]   ;;  %s1270_s5 = inlined_call_operand.vmem [shape: f32[3,8], index: 5, kind: input, shape index: {}]   ;;  %s1271_s6 = inlined_call_operand.vmem [shape: f32[1,4], index: 6, kind: input, shape index: {}]   ;;  %s1272_s7 = inlined_call_operand.vmem [shape: f32[1,4], index: 7, kind: input, shape index: {}]   ;;  %s1273_s8 = inlined_call_operand.hbm [shape: f32[1,4], index: 8, kind: output, shape index: {}]  }
   0x1   :  { %14 = vsyncpa [#allocation8], 0 }
   0x2   :  { %15 = vsyncpa [#allocation11], 0 }
   0x3   :  { %16 = vsyncpa [#allocation6], 0  ;;  %s1103_s27 = smov [#allocation7]  }
   0x4   :  { %s32_s28 = sshll.u32 %s1103_s27, 4  ;;  %s33_s28 = int_to_ptr.vmem [resolvable:$true] %s32_s28 }
   0x5   :  { %s1003_s29 = scalar_lea.vmem %s33_s28, 768  ;;  %p1008_p1 = scmp.lt.s32.totalorder %s33_s28, %s33_s28 }
   0x6   :  { %p1004_p0 = scmp.ne.s32.totalorder %s33_s28, %s1003_s29  ;;  %p1009_p2 = scmp.lt.s32.totalorder %s1003_s29, %s1003_s29 }
   0x8   :  { %p1010_p3 = por %p1009_p2, %p1008_p1 }
   0xa   :  { %p1011_p4 = pnand %p1010_p3, %p1004_p0 }
   0xc   :  { %1014 = shalt.err (!%p1011_p4)
}
   0xd   :  { %s1104_s30 = smov 192   ;;  %s1105_s9 = smov 12  }
   0xe   :  { %38 = dma.hbm_to_vmem [thread:$0]  %s1266_s1, 768, %s33_s28, [#allocation8], %s1104_s30, %s1104_s30, %s1105_s9  }
   0xf   :  { %s1106_s12 = smov [#allocation4]   ;;  %s1107_s14 = smov [#allocation9]  }
  0x10   :  { %s23_s13 = sshll.u32 %s1106_s12, 4  ;;  %s46_s15 = sshll.u32 %s1107_s14, 4  ;;  %s24_s13 = int_to_ptr.vmem [resolvable:$true] %s23_s13  ;;  %s47_s15 = int_to_ptr.vmem [resolvable:$true] %s46_s15 }
  0x11   :  { %s1023_s16 = scalar_lea.vmem %s24_s13, 64  ;;  %p1028_p6 = scmp.lt.s32.totalorder %s24_s13, %s24_s13 }
  0x12   :  { %p1024_p5 = scmp.ne.s32.totalorder %s24_s13, %s1023_s16  ;;  %p1029_p7 = scmp.lt.s32.totalorder %s1023_s16, %s1023_s16 }
  0x14   :  { %p1030_p8 = por %p1029_p7, %p1028_p6 }
  0x16   :  { %p1031_p9 = pnand %p1030_p8, %p1024_p5 }
  0x18   :  { %1034 = shalt.err (!%p1031_p9)
}
  0x19   :  { %26 = dma.hbm_to_vmem [thread:$0]  %s1265_s0, 64, %s24_s13, [#allocation5]  }
  0x1a   :  { %s1043_s19 = scalar_lea.vmem %s47_s15, 768  ;;  %p1048_p11 = scmp.lt.s32.totalorder %s47_s15, %s47_s15 }
  0x1b   :  { %p1044_p10 = scmp.ne.s32.totalorder %s47_s15, %s1043_s19  ;;  %p1049_p12 = scmp.lt.s32.totalorder %s1043_s19, %s1043_s19 }
  0x1d   :  { %p1050_p13 = por %p1049_p12, %p1048_p11 }
  0x1f   :  { %p1051_p0 = pnand %p1050_p13, %p1044_p10 }
  0x21   :  { %1054 = shalt.err (!%p1051_p0)
}
  0x22   :  { %52 = dma.hbm_to_vmem [thread:$0]  %s1268_s3, 768, %s47_s15, [#allocation8], %s1104_s30, %s1104_s30, %s1105_s9  }
  0x23   :  { %s1108_s21 = smov [#allocation10]  }
  0x24   :  { %s58_s22 = sshll.u32 %s1108_s21, 4  ;;  %s59_s22 = int_to_ptr.vmem [resolvable:$true] %s58_s22 }
  0x25   :  { %s1063_s23 = scalar_lea.vmem %s59_s22, 256  ;;  %p1068_p2 = scmp.lt.s32.totalorder %s59_s22, %s59_s22 }
  0x26   :  { %p1064_p1 = scmp.ne.s32.totalorder %s59_s22, %s1063_s23  ;;  %p1069_p3 = scmp.lt.s32.totalorder %s1063_s23, %s1063_s23 }
  0x28   :  { %p1070_p4 = por %p1069_p3, %p1068_p2 }
  0x2a   :  { %p1071_p5 = pnand %p1070_p4, %p1064_p1 }
  0x2c   :  { %1074 = shalt.err (!%p1071_p5)
}
  0x2d   :  { %s1109_s0 = smov 64   ;;  %s1110_s24 = smov 4  }
  0x2e   :  { %64 = dma.hbm_to_vmem [thread:$0]  %s1269_s4, 256, %s59_s22, [#allocation11], %s1109_s0, %s1109_s0, %s1110_s24  }
  0x2f   :  { %1095 = dma.done.wait [#allocation5], 64  }
  0x30   :  { %1096 = vsyncadd [#allocation5], 4294967232 }
  0x31   :  { %1097 = dma.done.wait [#allocation8], 1536  }
  0x32   :  { %1098 = vsyncadd [#allocation8], 4294965760 }
  0x33   :  { %1099 = dma.done.wait [#allocation11], 256  }
  0x34   :  { %1100 = vsyncadd [#allocation11], 4294967040  ;;  %vm84_vm0 = vcmask 261120   ;;  %v1111_v0 = vmov 0.0   ;;  %v1112_v1 = vmov 0   ;;  %vm1113_vm1 = vmmov 0  }
  0x35   :  { %876 = vmatprep.subr.bf16.mxu1 %v1111_v0  ;;  %179 = vmatprep.mubr.bf16.mxu0 %v1112_v1  ;;  %85 = vst.msk [vmem:[#allocation2] sm:$0xff] %vm84_vm0, %v1111_v0  ;;  %v947_v2 = vld [vmem:[#allocation7 + $0x1c] ss:$12 sps:$4 sm:$0xff]   ;;  %v949_v3 = vld [vmem:[#allocation7 + $0x18] ss:$12 sps:$4 sm:$0xff]   ;;  %v97_v9 = vlaneseq  ;;  %vm242_vm2 = vcmask 258048  }
  0x36   :  { %880 = vmatprep.mubr.msk.bf16.mxu1 %vm1113_vm1, %v1111_v0  ;;  %159 = vmatprep.subr.bf16.mxu0 %v947_v2  ;;  %v950_v4 = vld [vmem:[#allocation7 + $0x20] ss:$12 sps:$4 sm:$0xff]   ;;  %v951_v5 = vld [vmem:[#allocation7 + $0x4] ss:$12 sps:$4 sm:$0xff]   ;;  %v954_v7 = vld [vmem:[#allocation7 + $0x8] ss:$12 sps:$4 sm:$0xff]  }
  0x37   :  { %160 = vmatpush1.bf16.msra.mxu0 %v949_v3  ;;  %v953_v6 = vld [vmem:[#allocation7] ss:$12 sps:$4 sm:$0xff]   ;;  %877 = vmatpush3.bf16.msra.mxu1 %v950_v4  ;;  %v86_v8 = vld [vmem:[#allocation4] sm:$0xf]  ;;  %v1186_v10 = vshrl.u32 %v97_v9, 7  ;;  %vm244_vm3 = vcmask 4096  }
  0x38   :  { %161 = vmatprep.subr.bf16.mxu0 %v951_v5  ;;  %878 = vmatprep.subr.bf16.mxu1 %v1111_v0  ;;  %v95_v12 = vld [vmem:[%s1267_s2] sm:$0x7]  ;;  %vm275_vm4 = vcmask 1043456   ;;  %vm271_vm5 = vcmask 64512   ;;  %v957_v44 = vld [vmem:[#allocation9 + $0x1c] ss:$12 sps:$4 sm:$0xff]  }
  0x39   :  { %v99_v11 = vsub.s32 0, %v1186_v10  ;;  %v107_v13 = vsub.s32 2, %v1186_v10  ;;  %v103_v14 = vsub.s32 1, %v1186_v10  ;;  %v267_v40 = vld [vmem:[%s1270_s5] sm:$0x3]  ;;  %v1221_v62 = vld [vmem:[#allocation10 + $0x8] sm:$0xff]  }
  0x3a   :  { %v268_v43 = vpack.c.bf16 %v267_v40, %v267_v40  ;;  %v955_v45 = vld [vmem:[#allocation9 + $0x18] ss:$12 sps:$4 sm:$0xff]   ;;  %v1202_v46 = vld [vmem:[#allocation9 + $0x20] ss:$12 sps:$4 sm:$0xff]   ;;  %v1206_v49 = vld [vmem:[#allocation9 + $0x8] ss:$12 sps:$4 sm:$0xff]  }
  0x3b   :  { %162 = vmatpush1.bf16.msra.mxu0 %v953_v6  ;;  %879 = vmatpush3.bf16.msra.mxu1 %v954_v7  ;;  %v100_v15 = vrot.slane %v95_v12, %v99_v11  ;;  %v108_v16 = vrot.slane %v95_v12, %v107_v13  ;;  %v104_v17 = vrot.slane %v95_v12, %v103_v14  ;;  %v961_v47 = vld [vmem:[#allocation9 + $0x4] ss:$12 sps:$4 sm:$0xff]   ;;  %v959_v48 = vld [vmem:[#allocation9] ss:$12 sps:$4 sm:$0xff]   ;;  %vm535_vm6 = vcmask 260101  }
  0x3c   :  { %884 = vmatprep.subr.bf16.mxu0 %v1111_v0  ;;  %370 = vmatprep.subr.bf16.mxu1 %v957_v44  ;;  %v1225_v63 = vld [vmem:[#allocation10] sm:$0xff]   ;;  %vm540_vm7 = vcmask 1024   ;;  %vm785_vm8 = vcmask 253952   ;;  %vm798_vm9 = vcmask 24576  }
  0x3e   :  { %834 = vmatmul.mubr.msk.bf16.vlgmr.msra.gmra.mxu0 %vm84_vm0, %v86_v8  ;;  %881 = vmatmul.mubr.msk.bf16.vlgmr.msra.gmra.mxu1 %vm84_vm0, %v86_v8 }
  0x3f   :  { %886 = vmatprep.mubr.msk.bf16.mxu0 %vm1113_vm1, %v1111_v0  ;;  %390 = vmatprep.mubr.bf16.mxu1 %v1112_v1 }
  0x40   :  { %371 = vmatpush1.bf16.msra.mxu1 %v955_v45 }
  0x41   :  { %372 = vmatprep.subr.bf16.mxu1 %v961_v47 }
  0x44   :  { %373 = vmatpush1.bf16.msra.mxu1 %v959_v48 }
  0x45   :  { %898 = vmatprep.subr.bf16.mxu1 %v1111_v0 }
  0xfe   :  { %v181_v18 = vpop.f32.mrf.mxu0  ;;  %v222_v20 = vpop.f32.mrf.mxu1 }
  0xff   :  { %v182_v19 = vadd.f32 %v181_v18, %v100_v15  ;;  %v223_v22 = vadd.f32 %v222_v20, %v108_v16 }
 0x100   :  { %v183_v21 = vpop.f32.mrf.mxu0  ;;  %v882_v24 = vpop.f32.mrf.mxu1 }
 0x101   :  { %228 = vst [vmem:[#allocation3] sm:$0xff] %v182_v19  ;;  %v184_v23 = vadd.f32 %v183_v21, %v104_v17  ;;  %230 = vst [vmem:[#allocation3 + $0x10] sm:$0xff] %v223_v22 }
 0x102   :  { %v185_v25 = vpop.f32.mrf.mxu0  ;;  %v225_v26 = vpop.f32.mrf.mxu1 }
 0x103   :  { %229 = vst [vmem:[#allocation3 + $0x8] sm:$0xff] %v184_v23 }
 0x104   :  { %v186_v27 = vpop.f32.mrf.mxu0  ;;  %v883_v28 = vpop.f32.mrf.mxu1 }
 0x108   :  { %v231_v29 = vld [vmem:[#allocation3] sm:$0x1f]  ;;  %v232_v31 = vld [vmem:[#allocation3 + $0x10] sm:$0x1f]  ;;  %v319_v22 = vld [vmem:[#allocation3] sm:$0x60] }
 0x109   :  { %v836_v30 = vmul.f32 -1.442695, %v231_v29  ;;  %v321_v28 = vld [vmem:[#allocation3 + $0x10] sm:$0x60] }
 0x10a   :  { %v320_v7 = vld [vmem:[#allocation3 + $0x8] sm:$0x60] }
 0x10b   :  { %965 = vpow2.f32 %v836_v30 }
 0x10c   :  { %967 = vtanh.f32 %v232_v31 }
 0x118   :  { %v966_v32 = vpop.eup %965 }
 0x119   :  { %v236_v33 = vadd.f32 1.0, %v966_v32  ;;  %v968_v34 = vpop.eup %967 }
 0x11b   :  { %969 = vrcp.f32 %v236_v33 }
 0x128   :  { %v970_v35 = vpop.eup %969 }
 0x129   :  { %v240_v36 = vsub.f32 1.0, %v970_v35 }
 0x12b   :  { %v241_v37 = vmul.f32 %v968_v34, %v240_v36 }
 0x12d   :  { %v245_v38 = vsel %vm244_vm3, %v241_v37, 0.0  ;;  %243 = vst.msk [vmem:[#allocation2] sm:$0x1f] %vm242_vm2, %v241_v37 }
 0x12e   :  { %246 = vadd.xlane.f32.xlu0 %v245_v38 }
 0x134   :  { %v269_v39 = vld [vmem:[#allocation2] sm:$0xff] }
 0x135   :  { %v270_v41 = vpack.c.bf16 %v269_v39, %v269_v39 }
 0x137   :  { %v277_v42 = vsel %vm275_vm4, %v270_v41, 0 }
 0x138   :  { %885 = vmatpush3.bf16.msra.mxu0 %v277_v42 }
 0x139   :  { %890 = vmatprep.subr.bf16.mxu0 %v1111_v0 }
 0x13b   :  { %887 = vmatmul.mubr.msk.bf16.vlgmr.msra.gmra.mxu0 %vm271_vm5, %v268_v43 }
 0x13c   :  { %894 = vmatprep.mubr.msk.bf16.mxu0 %vm1113_vm1, %v1111_v0  ;;  %891 = vmatpush3.bf16.msra.mxu0 %v1202_v46 }
 0x13d   :  { %892 = vmatprep.subr.bf16.mxu0 %v1111_v0 }
 0x140   :  { %893 = vmatpush3.bf16.msra.mxu0 %v1206_v49 }
 0x141   :  { %906 = vmatprep.subr.bf16.mxu0 %v1111_v0 }
 0x1b7   :  { %v247_v50 = vpop.xlane.xlu0 %246 }
 0x1b8   :  { %v248_v51 = vrot.slane %v247_v50, 4 }
 0x1ba   :  { %v249_v52 = vadd.f32 %v248_v51, %v247_v50 }
 0x1bc   :  { %v250_v53 = vrot.slane %v249_v52, 2 }
 0x1be   :  { %v251_v54 = vadd.f32 %v250_v53, %v249_v52 }
 0x1c0   :  { %v252_v55 = vrot.slane %v251_v54, 1 }
 0x1c2   :  { %v253_v56 = vadd.f32 %v252_v55, %v251_v54 }
 0x1c4   :  { %928 = vpush %v253_v56 }
 0x1fb   :  { %v1211_v57 = vpop.f32.mrf.mxu0 }
 0x1fc   :  { %v322_v58 = vpack.c.bf16 %v1211_v57, %v1211_v57  ;;  %v529_v36 = vrot.slane %v1211_v57, 3 }
 0x1fd   :  { %v888_v59 = vpop.f32.mrf.mxu0 }
 0x1fe   :  { %844 = vmatmul.mubr.msk.bf16.vlgmr.msra.gmra.mxu1 %vm84_vm0, %v322_v58  ;;  %895 = vmatmul.mubr.msk.bf16.vlgmr.msra.gmra.mxu0 %vm84_vm0, %v322_v58 }
 0x1ff   :  { %v316_v60 = vpop.f32.mrf.mxu0  ;;  %902 = vmatprep.mubr.msk.bf16.mxu1 %vm1113_vm1, %v1111_v0  ;;  %908 = vmatprep.mubr.msk.bf16.mxu0 %vm1113_vm1, %v1111_v0 }
 0x200   :  { %899 = vmatpush3.bf16.msra.mxu1 %v1221_v62 }
 0x201   :  { %v889_v61 = vpop.f32.mrf.mxu0  ;;  %900 = vmatprep.subr.bf16.mxu1 %v1111_v0 }
 0x202   :  { %v1114_v61 = vmov 1966171168  }
 0x204   :  { %901 = vmatpush3.bf16.msra.mxu1 %v1225_v63 }
 0x205   :  { %620 = vmatprep.subr.bf16.mxu1 %v957_v44 }
 0x2be   :  { %v392_v2 = vpop.f32.mrf.mxu1  ;;  %v433_v3 = vpop.f32.mrf.mxu0 }
 0x2bf   :  { %v442_v21 = vrot.slane %v392_v2, 3  ;;  %v444_v27 = vrot.slane %v433_v3, 3  ;;  %v694_v2 = vunpack.c.l.s4 %v1114_v61 }
 0x2c0   :  { %v394_v4 = vpop.f32.mrf.mxu1  ;;  %v896_v5 = vpop.f32.mrf.mxu0 }
 0x2c1   :  { %v443_v6 = vrot.slane %v394_v4, 3  ;;  %v448_v23 = vadd.f32 %v442_v21, %v319_v22  ;;  %v450_v30 = vadd.f32 %v444_v27, %v321_v28  ;;  %v695_v3 = vunpack.c.0.s8 %v694_v2 }
 0x2c2   :  { %v396_v8 = vpop.f32.mrf.mxu1  ;;  %v436_v9 = vpop.f32.mrf.mxu0 }
 0x2c3   :  { %v449_v11 = vadd.f32 %v443_v6, %v320_v7  ;;  %v846_v24 = vmul.f32 -1.442695, %v448_v23  ;;  %v698_v6 = vsub.s32 %v695_v3, %v1186_v10 }
 0x2c4   :  { %v397_v12 = vpop.f32.mrf.mxu1  ;;  %v897_v13 = vpop.f32.mrf.mxu0 }
 0x2c5   :  { %v847_v14 = vmul.f32 -1.442695, %v449_v11 }
 0x2c7   :  { %971 = vpow2.f32 %v847_v14 }
 0x2d4   :  { %v972_v15 = vpop.eup %971 }
 0x2d5   :  { %v460_v16 = vadd.f32 1.0, %v972_v15 }
 0x2d7   :  { %973 = vrcp.f32 %v460_v16 }
 0x2d8   :  { %975 = vpow2.f32 %v846_v24 }
 0x2e4   :  { %v974_v17 = vpop.eup %973 }
 0x2e5   :  { %v464_v18 = vrot.slane %v974_v17, 5  ;;  %v976_v25 = vpop.eup %975  ;;  %v603_v17 = vld [vmem:[#allocation3 + $0x7] ss:$8 sm:$0x7] }
 0x2e6   :  { %v454_v26 = vadd.f32 1.0, %v976_v25 }
 0x2e7   :  { %v466_v19 = vmul.f32 %v464_v18, %v1211_v57 }
 0x2e8   :  { %977 = vrcp.f32 %v454_v26 }
 0x2e9   :  { %v467_v20 = vpack.c.bf16 %v466_v19, %v466_v19 }
 0x2eb   :  { %903 = vmatmul.mubr.msk.bf16.vlgmr.msra.gmra.mxu1 %vm84_vm0, %v467_v20 }
 0x2ec   :  { %621 = vmatpush1.bf16.msra.mxu1 %v955_v45  ;;  %640 = vmatprep.mubr.bf16.mxu1 %v1112_v1  ;;  %v552_v45 = vld [vmem:[%s1270_s5 + $0x2] sm:$0x1]  ;;  %s929_s5 = spop %928 }
 0x2ed   :  { %622 = vmatprep.subr.bf16.mxu1 %v961_v47  ;;  %v553_v50 = vpack.c.bf16 %v552_v45, %v552_v45 }
 0x2f0   :  { %623 = vmatpush1.bf16.msra.mxu1 %v959_v48 }
 0x2f1   :  { %920 = vmatprep.subr.bf16.mxu1 %v1111_v0 }
 0x2f5   :  { %v978_v35 = vpop.eup %977 }
 0x2f6   :  { %v532_v37 = vsub.f32 1.0, %v978_v35  ;;  %v531_v39 = vmul.f32 %v978_v35, %v529_v36 }
 0x3ab   :  { %v517_v29 = vpop.f32.mrf.mxu1 }
 0x3ac   :  { %v524_v31 = vrot.slane %v517_v29, 3 }
 0x3ad   :  { %v904_v32 = vpop.f32.mrf.mxu1 }
 0x3ae   :  { %v526_v33 = vadd.f32 %v524_v31, %v450_v30 }
 0x3af   :  { %v520_v1 = vpop.f32.mrf.mxu1 }
 0x3b0   :  { %979 = vtanh.f32 %v526_v33 }
 0x3b1   :  { %v905_v34 = vpop.f32.mrf.mxu1 }
 0x3bd   :  { %v980_v38 = vpop.eup %979 }
 0x3be   :  { %v533_v40 = vmul.f32 %v980_v38, %v532_v37  ;;  %v793_v38 = vld [vmem:[%s1271_s6] sm:$0x1]  ;;  %s1115_s6 = smov [#allocation12]  }
 0x3bf   :  { %s817_s17 = sshll.u32 %s1115_s6, 4  ;;  %s818_s17 = int_to_ptr.vmem [resolvable:$true] %s817_s17 }
 0x3c0   :  { %v534_v41 = vadd.f32 %v533_v40, %v531_v39  ;;  %v796_v40 = vld [vmem:[%s1272_s7] sm:$0x1]  ;;  %s1075_s7 = scalar_lea.vmem %s818_s17, 16  ;;  %s1079_s18 = scalar_lea.vmem %s818_s17, 32 }
 0x3c1   :  { %p1076_p6 = scmp.ne.s32.totalorder %s818_s17, %s1075_s7  ;;  %p1080_p7 = scmp.lt.s32.totalorder %s818_s17, %s818_s17 }
 0x3c2   :  { %v538_v42 = vrot.slane %v534_v41, 5  ;;  %536 = vst.msk [vmem:[#allocation2] sm:$0x60] %vm535_vm6, %v534_v41  ;;  %p1081_p8 = scmp.lt.s32.totalorder %s1079_s18, %s1075_s7 }
 0x3c4   :  { %v541_v43 = vsel %vm540_vm7, %v538_v42, 0.0  ;;  %p1082_p9 = por %p1081_p8, %p1080_p7 }
 0x3c5   :  { %542 = vadd.xlane.f32.xlu0 %v541_v43 }
 0x3c6   :  { %p1083_p10 = pnand %p1082_p9, %p1076_p6 }
 0x3c9   :  { %v554_v44 = vld [vmem:[#allocation2] sm:$0xff] }
 0x3ca   :  { %v555_v47 = vpack.c.bf16 %v554_v44, %v554_v44 }
 0x3cc   :  { %v560_v48 = vsel %vm275_vm4, %v555_v47, 0 }
 0x3cd   :  { %907 = vmatpush3.bf16.msra.mxu0 %v560_v48 }
 0x3ce   :  { %912 = vmatprep.subr.bf16.mxu0 %v1111_v0 }
 0x3d0   :  { %909 = vmatmul.mubr.msk.bf16.vlgmr.msra.gmra.mxu0 %vm271_vm5, %v553_v50 }
 0x3d1   :  { %913 = vmatpush3.bf16.msra.mxu0 %v1202_v46  ;;  %916 = vmatprep.mubr.msk.bf16.mxu0 %vm1113_vm1, %v1111_v0 }
 0x3d2   :  { %914 = vmatprep.subr.bf16.mxu0 %v1111_v0 }
 0x3d5   :  { %915 = vmatpush3.bf16.msra.mxu0 %v1206_v49 }
 0x44e   :  { %v543_v51 = vpop.xlane.xlu0 %542 }
 0x44f   :  { %v544_v52 = vrot.slane %v543_v51, 4 }
 0x451   :  { %v545_v53 = vadd.f32 %v544_v52, %v543_v51 }
 0x453   :  { %v546_v54 = vrot.slane %v545_v53, 2 }
 0x455   :  { %v547_v55 = vadd.f32 %v546_v54, %v545_v53 }
 0x457   :  { %v548_v56 = vrot.slane %v547_v55, 1 }
 0x459   :  { %v549_v57 = vadd.f32 %v548_v56, %v547_v55 }
 0x45b   :  { %930 = vpush %v549_v57 }
 0x48c   :  { %s931_s30 = spop %930 }
 0x48d   :  { %s551_s9 = sadd.f32 %s931_s30, %s929_s5 }
 0x490   :  { %v596_v58 = vpop.f32.mrf.mxu0 }
 0x491   :  { %v604_v59 = vpack.c.bf16 %v596_v58, %v596_v58 }
 0x492   :  { %v910_v60 = vpop.f32.mrf.mxu0 }
 0x493   :  { %852 = vmatmul.mubr.msk.bf16.vlgmr.msra.gmra.mxu1 %vm84_vm0, %v604_v59  ;;  %917 = vmatmul.mubr.msk.bf16.vlgmr.msra.gmra.mxu0 %vm84_vm0, %v604_v59 }
 0x494   :  { %v599_v46 = vpop.f32.mrf.mxu0  ;;  %921 = vmatpush3.bf16.msra.mxu1 %v1221_v62  ;;  %924 = vmatprep.mubr.msk.bf16.mxu1 %vm1113_vm1, %v1111_v0 }
 0x495   :  { %922 = vmatprep.subr.bf16.mxu1 %v1111_v0 }
 0x496   :  { %v911_v49 = vpop.f32.mrf.mxu0 }
 0x498   :  { %923 = vmatpush3.bf16.msra.mxu1 %v1225_v63 }
 0x553   :  { %v642_v4 = vpop.f32.mrf.mxu1  ;;  %v683_v5 = vpop.f32.mrf.mxu0 }
 0x554   :  { %v706_v12 = vrot.slane %v683_v5, %v698_v6 }
 0x555   :  { %v644_v7 = vpop.f32.mrf.mxu1  ;;  %v918_v8 = vpop.f32.mrf.mxu0 }
 0x556   :  { %v692_v9 = vcombine.low %v642_v4, %v644_v7 }
 0x557   :  { %v646_v11 = vpop.f32.mrf.mxu1  ;;  %v686_v62 = vpop.f32.mrf.mxu0 }
 0x558   :  { %v699_v13 = vrot.slane %v692_v9, %v698_v6 }
 0x559   :  { %v647_v14 = vpop.f32.mrf.mxu1  ;;  %v919_v15 = vpop.f32.mrf.mxu0 }
 0x55a   :  { %v707_v0 = vcombine.low %v699_v13, %v706_v12 }
 0x55c   :  { %v714_v16 = vrot.slane %v707_v0, %v698_v6 }
 0x55e   :  { %v716_v63 = vadd.f32 %v714_v16, %v603_v17 }
 0x560   :  { %v724_v18 = vrot.slane %v716_v63, 1  ;;  %v854_v24 = vmul.f32 -1.442695, %v716_v63  ;;  %v777_v27 = vrot.slane %v716_v63, 2 }
 0x562   :  { %v855_v19 = vmul.f32 -1.442695, %v724_v18 }
 0x564   :  { %981 = vpow2.f32 %v855_v19 }
 0x571   :  { %v982_v20 = vpop.eup %981 }
 0x572   :  { %v729_v21 = vadd.f32 1.0, %v982_v20 }
 0x574   :  { %983 = vrcp.f32 %v729_v21 }
 0x575   :  { %985 = vpow2.f32 %v854_v24 }
 0x581   :  { %v984_v10 = vpop.eup %983 }
 0x582   :  { %v732_v22 = vmul.f32 %v984_v10, %v596_v58  ;;  %v986_v25 = vpop.eup %985 }
 0x583   :  { %v720_v26 = vadd.f32 1.0, %v986_v25 }
 0x584   :  { %v733_v23 = vpack.c.bf16 %v732_v22, %v732_v22 }
 0x585   :  { %987 = vrcp.f32 %v720_v26 }
 0x586   :  { %925 = vmatmul.mubr.msk.bf16.vlgmr.msra.gmra.mxu1 %vm84_vm0, %v733_v23 }
 0x592   :  { %v988_v33 = vpop.eup %987 }
 0x593   :  { %v782_v1 = vsub.f32 1.0, %v988_v33  ;;  %v781_v35 = vmul.f32 %v988_v33, %v596_v58 }
 0x646   :  { %v771_v28 = vpop.f32.mrf.mxu1 }
 0x647   :  { %v779_v29 = vadd.f32 %v777_v27, %v771_v28 }
 0x648   :  { %v926_v30 = vpop.f32.mrf.mxu1 }
 0x649   :  { %989 = vtanh.f32 %v779_v29 }
 0x64a   :  { %v774_v31 = vpop.f32.mrf.mxu1 }
 0x64c   :  { %v927_v32 = vpop.f32.mrf.mxu1 }
 0x656   :  { %v990_v34 = vpop.eup %989 }
 0x657   :  { %v783_v36 = vmul.f32 %v990_v34, %v782_v1 }
 0x659   :  { %v784_v37 = vadd.f32 %v783_v36, %v781_v35 }
 0x65b   :  { %786 = vst.msk [vmem:[#allocation2 + $0x7] sm:$0x1] %vm785_vm8, %v784_v37 }
 0x65c   :  { %932 = vpush %v784_v37 }
 0x68d   :  { %s933_s10 = spop %932 }
 0x68e   :  { %s789_s11 = sadd.f32 %s933_s10, %s551_s9 }
 0x690   :  { %s792_s12 = smul.f32 0.125, %s789_s11 }
 0x692   :  { %v794_v39 = vstv %s792_s12 }
 0x693   :  { %v795_v41 = vmul.f32 %v794_v39, %v793_v38 }
 0x695   :  { %v797_v42 = vadd.f32 %v796_v40, %v795_v41 }
 0x697   :  { %v799_v43 = vsel %vm798_vm9, %v797_v42, -inf }
 0x698   :  { %800 = vmax.xlane.f32.xlu1 %v799_v43 }
 0x721   :  { %v801_v44 = vpop.xlane.xlu1 %800 }
 0x722   :  { %v802_v45 = vsub.f32 %v797_v42, %v801_v44 }
 0x724   :  { %v803_v47 = vmul.f32 1.442695, %v802_v45 }
 0x726   :  { %991 = vpow2.f32 %v803_v47 }
 0x733   :  { %v992_v48 = vpop.eup %991 }
 0x734   :  { %v805_v50 = vsel %vm798_vm9, %v992_v48, 0.0 }
 0x735   :  { %806 = vadd.xlane.f32.xlu1 %v805_v50 }
 0x7be   :  { %v807_v51 = vpop.xlane.xlu1 %806 }
 0x7bf   :  { %993 = vrcp.f32 %v807_v51 }
 0x7cc   :  { %v994_v52 = vpop.eup %993 }
 0x7cd   :  { %v809_v53 = vmul.f32 %v994_v52, %v992_v48 }
 0x7cf   :  { %810 = vst.msk [vmem:[#allocation12] sm:$0x1] %vm798_vm9, %v809_v53 }
 0x7d0   :  { %1086 = shalt.err (!%p1083_p10)
}
 0x7d1   :  { %820 = dma.vmem_to_hbm [thread:$0]  %s818_s17, 16, %s1273_s8, [#allocation6]  }
 0x7d2   :  { %1101 = dma.done.wait [#allocation6], 16  }
 0x7d3   :  { %1102 = vsyncadd [#allocation6], 4294967280 }
 0x7d4   :  { %824 = vsyncpa [#allocation5], 1 }
 0x7d5   :  { %825 = vsyncpa [#allocation8], 1 }
 0x7d6   :  { %826 = vsyncpa [#allocation11], 1 }
 0x7d7   :  { %827 = vsyncpa [#allocation6], 1 }

</bundles_post_ra>
